<compile_context>
chip_gen: v5e
topology: v5e:2x2
jax: 0.10.0
libtpu: 0.0.40
codegen_flags: <defaults>
</compile_context>

<pallas_src>
import jax
import jax.numpy as jnp
from jax.experimental import pallas as pl
from jax.experimental.pallas import tpu as pltpu

HIDDEN = 64
SUBLANE = 8       # vreg sublane height (second-to-last block dim granularity)
MAX_TB = 4096     # max batch-tile rows; with unpadded lane dims this is tiny VMEM


def _round_up(x, m):
    return (x + m - 1) // m * m


def _mlp_kernel(x_ref, w1_ref, b1_ref, w2_ref, b2_ref, w3_ref, b3_ref, o_ref):
    """Fused 3-layer MLP on one batch tile:
    relu(xW1+b1) -> relu(.W2+b2) -> sigmoid(.W3+b3)."""
    x = x_ref[...]

    h1 = jnp.dot(x, w1_ref[...], preferred_element_type=jnp.float32) + b1_ref[...]
    h1 = jnp.maximum(h1, 0.0)

    h2 = jnp.dot(h1, w2_ref[...], preferred_element_type=jnp.float32) + b2_ref[...]
    h2 = jnp.maximum(h2, 0.0)

    z = jnp.dot(h2, w3_ref[...], preferred_element_type=jnp.float32) + b3_ref[...]
    o_ref[...] = jax.nn.sigmoid(z)


@jax.jit
def feedforward_nn(obs, params):
    """Pallas forward pass of FeeedForwardNN.

    obs: (B, in_dim) float32
    params: dict with w1 (in_dim,64), b1 (1,64), w2 (64,64), b2 (1,64),
            w3 (64,out_dim), b3 (1,out_dim)
    returns: (B, out_dim) float32
    """
    obs = obs.astype(jnp.float32)
    B, in_dim = obs.shape
    out_dim = params["w3"].shape[1]

    # Batch tile: multiple of 8 rows, ~half the batch (so large batches split
    # into >=2 balanced blocks for v7x's 2 TensorCores), capped at MAX_TB.
    tb = min(MAX_TB, max(SUBLANE, _round_up(pl.cdiv(B, 2), SUBLANE)))
    grid = (pl.cdiv(B, tb),)   # ragged tail block is masked by Pallas

    w1 = params["w1"]   # (in_dim, 64)
    b1 = params["b1"]   # (1, 64)
    w2 = params["w2"]   # (64, 64)
    b2 = params["b2"]   # (1, 64)
    w3 = params["w3"]   # (64, out_dim)
    b3 = params["b3"]   # (1, out_dim)

    # Weights/biases: whole-array block, constant block index -> stay resident
    # in VMEM across all grid steps (no re-DMA per tile).
    def resident(shape):
        return pl.BlockSpec(shape, lambda i, _n=len(shape): (0,) * _n)

    # True (unpadded) cost numbers.
    cost = pl.CostEstimate(
        flops=2 * B * (in_dim * HIDDEN + HIDDEN * HIDDEN + HIDDEN * out_dim),
        transcendentals=B * out_dim,  # sigmoid exp
        bytes_accessed=4 * (B * in_dim + B * out_dim
                            + in_dim * HIDDEN + HIDDEN * HIDDEN
                            + HIDDEN * out_dim + 2 * HIDDEN + out_dim),
    )

    out = pl.pallas_call(
        _mlp_kernel,
        out_shape=jax.ShapeDtypeStruct((B, out_dim), jnp.float32),
        grid=grid,
        in_specs=[
            # Streamed batch tile; full-extent last dim (== in_dim) is exempt
            # from the 128-lane divisibility rule and is one contiguous DMA.
            pl.BlockSpec((tb, in_dim), lambda i: (i, 0)),
            resident(w1.shape),
            resident(b1.shape),
            resident(w2.shape),
            resident(b2.shape),
            resident(w3.shape),
            resident(b3.shape),
        ],
        out_specs=pl.BlockSpec((tb, out_dim), lambda i: (i, 0)),
        compiler_params=pltpu.CompilerParams(
            dimension_semantics=("parallel",),     # shards across v7x's 2 TCs
            vmem_limit_bytes=32 * 1024 * 1024,     # plenty; footprint is ~1 MiB
        ),
        cost_estimate=cost,
    )(obs, w1, b1, w2, b2, w3, b3)

    return out


def _orthogonal(key, rows, cols):
    """Deterministic orthogonal init (same semantics as nn.init.orthogonal_):
    returns a (rows, cols) matrix with orthonormal rows (if rows<=cols) or
    orthonormal columns (if rows>cols)."""
    flat_rows, flat_cols = (rows, cols) if rows >= cols else (cols, rows)
    a = jax.random.normal(key, (flat_rows, flat_cols), dtype=jnp.float32)
    q, r = jnp.linalg.qr(a)
    # Sign correction so the decomposition is unique (0 -> +1, matching sgn).
    d = jnp.sign(jnp.diagonal(r))
    d = jnp.where(d == 0, 1.0, d)
    q = q * d[None, :]
    if rows < cols:
        q = q.T
    return q[:rows, :cols]


def init_params(key, in_dim, out_dim):
    """Deterministic parameter init mirroring FeeedForwardNN.__init__.

    Weights: orthogonal (like nn.init.orthogonal_).
    Biases:  U(-1/sqrt(fan_in), 1/sqrt(fan_in)) (PyTorch Linear default).
    Stored transposed, i.e. shape (in_features, out_features)."""
    k1, k2, k3, kb1, kb2, kb3 = jax.random.split(key, 6)

    # torch weight shapes are (out, in); build those, then transpose for x @ W.
    w1_t = _orthogonal(k1, HIDDEN, in_dim)     # (64, in_dim)
    w2_t = _orthogonal(k2, HIDDEN, HIDDEN)     # (64, 64)
    w3_t = _orthogonal(k3, out_dim, HIDDEN)    # (out_dim, 64)

    def bias(k, fan_in, n):
        bound = 1.0 / jnp.sqrt(jnp.float32(fan_in))
        return jax.random.uniform(k, (1, n), jnp.float32, -bound, bound)

    return {
        "w1": w1_t.T,                      # (in_dim, 64)
        "b1": bias(kb1, in_dim, HIDDEN),   # (1, 64)
        "w2": w2_t.T,                      # (64, 64)
        "b2": bias(kb2, HIDDEN, HIDDEN),   # (1, 64)
        "w3": w3_t.T,                      # (64, out_dim)
        "b3": bias(kb3, HIDDEN, out_dim),  # (1, out_dim)
    }


def _reference(obs, p):
    h1 = jnp.maximum(obs @ p["w1"] + p["b1"], 0.0)
    h2 = jnp.maximum(h1 @ p["w2"] + p["b2"], 0.0)
    return jax.nn.sigmoid(h2 @ p["w3"] + p["b3"])


if __name__ == "__main__":
    in_dim, out_dim, batch = 16, 4, 8

    key = jax.random.PRNGKey(0)
    k_params, k_obs = jax.random.split(key)

    params = init_params(k_params, in_dim, out_dim)
    obs = jax.random.normal(k_obs, (batch, in_dim), dtype=jnp.float32)

    out = feedforward_nn(obs, params)
    out = jax.block_until_ready(out)

    ref = _reference(obs, params)
    assert out.shape == (batch, out_dim), out.shape
    assert jnp.allclose(out, ref, atol=1e-5, rtol=1e-5), "mismatch vs reference"

    # Also exercise a larger, ragged batch to hit the multi-tile (2-block,
    # masked-tail) pipelined path.
    obs_big = jax.random.normal(jax.random.PRNGKey(1), (1037, in_dim), jnp.float32)
    out_big = jax.block_until_ready(feedforward_nn(obs_big, params))
    assert out_big.shape == (1037, out_dim)
    assert jnp.allclose(out_big, _reference(obs_big, params), atol=1e-5, rtol=1e-5)

    print("KERNEL_OK")
</pallas_src>

<mosaic_0001>
module attributes {stable_mosaic.version = 11 : i64} {
  func.func @_mlp_kernel(%arg0: i32, %arg1: memref<8x16xf32, #tpu.memory_space<vmem>>, %arg2: memref<16x64xf32, #tpu.memory_space<vmem>>, %arg3: memref<1x64xf32, #tpu.memory_space<vmem>>, %arg4: memref<64x64xf32, #tpu.memory_space<vmem>>, %arg5: memref<1x64xf32, #tpu.memory_space<vmem>>, %arg6: memref<64x4xf32, #tpu.memory_space<vmem>>, %arg7: memref<1x4xf32, #tpu.memory_space<vmem>>, %arg8: memref<8x4xf32, #tpu.memory_space<vmem>>) attributes {dimension_semantics = [#tpu.dimension_semantics<parallel>], iteration_bounds = array<i64: 1>, scalar_prefetch = 0 : i64, scratch_operands = 0 : i64, tpu.core_type = #tpu.core_type<tc>, window_params = [{transform_indices = @transform_0, window_bounds = array<i64: 8, 16>}, {pipeline_mode = #tpu.pipeline_mode<synchronous>, transform_indices = @transform_1, window_bounds = array<i64: 16, 64>}, {pipeline_mode = #tpu.pipeline_mode<synchronous>, transform_indices = @transform_2, window_bounds = array<i64: 1, 64>}, {pipeline_mode = #tpu.pipeline_mode<synchronous>, transform_indices = @transform_3, window_bounds = array<i64: 64, 64>}, {pipeline_mode = #tpu.pipeline_mode<synchronous>, transform_indices = @transform_4, window_bounds = array<i64: 1, 64>}, {pipeline_mode = #tpu.pipeline_mode<synchronous>, transform_indices = @transform_5, window_bounds = array<i64: 64, 4>}, {pipeline_mode = #tpu.pipeline_mode<synchronous>, transform_indices = @transform_6, window_bounds = array<i64: 1, 4>}, {transform_indices = @transform_7, window_bounds = array<i64: 8, 4>}]} {
    %c0 = arith.constant 0 : index
    %c0_0 = arith.constant 0 : index
    %0 = vector.load %arg1[%c0, %c0_0] : memref<8x16xf32, #tpu.memory_space<vmem>>, vector<8x16xf32>
    %c0_1 = arith.constant 0 : index
    %c0_2 = arith.constant 0 : index
    %1 = vector.load %arg2[%c0_1, %c0_2] : memref<16x64xf32, #tpu.memory_space<vmem>>, vector<16x64xf32>
    %cst = arith.constant dense<0.000000e+00> : vector<8x64xf32>
    %2 = tpu.matmul %0, %1, %cst {dimension_numbers = #tpu.dot_dimension_numbers<[1], [0], [0], [1], [0, 0, 1, 1], [], []>} : vector<8x16xf32>, vector<16x64xf32>, vector<8x64xf32> -> vector<8x64xf32>
    %c0_3 = arith.constant 0 : index
    %c0_4 = arith.constant 0 : index
    %3 = vector.load %arg3[%c0_3, %c0_4] : memref<1x64xf32, #tpu.memory_space<vmem>>, vector<1x64xf32>
    %4 = vector.broadcast %3 : vector<1x64xf32> to vector<8x64xf32>
    %5 = arith.addf %2, %4 : vector<8x64xf32>
    %cst_5 = arith.constant 0.000000e+00 : f32
    %6 = vector.broadcast %cst_5 : f32 to vector<8x64xf32>
    %7 = arith.maximumf %5, %6 : vector<8x64xf32>
    %c0_6 = arith.constant 0 : index
    %c0_7 = arith.constant 0 : index
    %8 = vector.load %arg4[%c0_6, %c0_7] : memref<64x64xf32, #tpu.memory_space<vmem>>, vector<64x64xf32>
    %cst_8 = arith.constant dense<0.000000e+00> : vector<8x64xf32>
    %9 = tpu.matmul %7, %8, %cst_8 {dimension_numbers = #tpu.dot_dimension_numbers<[1], [0], [0], [1], [0, 0, 1, 1], [], []>} : vector<8x64xf32>, vector<64x64xf32>, vector<8x64xf32> -> vector<8x64xf32>
    %c0_9 = arith.constant 0 : index
    %c0_10 = arith.constant 0 : index
    %10 = vector.load %arg5[%c0_9, %c0_10] : memref<1x64xf32, #tpu.memory_space<vmem>>, vector<1x64xf32>
    %11 = vector.broadcast %10 : vector<1x64xf32> to vector<8x64xf32>
    %12 = arith.addf %9, %11 : vector<8x64xf32>
    %cst_11 = arith.constant 0.000000e+00 : f32
    %13 = vector.broadcast %cst_11 : f32 to vector<8x64xf32>
    %14 = arith.maximumf %12, %13 : vector<8x64xf32>
    %c0_12 = arith.constant 0 : index
    %c0_13 = arith.constant 0 : index
    %15 = vector.load %arg6[%c0_12, %c0_13] : memref<64x4xf32, #tpu.memory_space<vmem>>, vector<64x4xf32>
    %cst_14 = arith.constant dense<0.000000e+00> : vector<8x4xf32>
    %16 = tpu.matmul %14, %15, %cst_14 {dimension_numbers = #tpu.dot_dimension_numbers<[1], [0], [0], [1], [0, 0, 1, 1], [], []>} : vector<8x64xf32>, vector<64x4xf32>, vector<8x4xf32> -> vector<8x4xf32>
    %c0_15 = arith.constant 0 : index
    %c0_16 = arith.constant 0 : index
    %17 = vector.load %arg7[%c0_15, %c0_16] : memref<1x4xf32, #tpu.memory_space<vmem>>, vector<1x4xf32>
    %18 = vector.broadcast %17 : vector<1x4xf32> to vector<8x4xf32>
    %19 = arith.addf %16, %18 : vector<8x4xf32>
    %20 = arith.negf %19 : vector<8x4xf32>
    %21 = math.exp %20 : vector<8x4xf32>
    %cst_17 = arith.constant 1.000000e+00 : f32
    %22 = vector.broadcast %cst_17 : f32 to vector<8x4xf32>
    %23 = arith.addf %22, %21 : vector<8x4xf32>
    %24 = arith.divf %22, %23 : vector<8x4xf32>
    %c0_18 = arith.constant 0 : index
    %c0_19 = arith.constant 0 : index
    %25 = vector.load %arg8[%c0_18, %c0_19] : memref<8x4xf32, #tpu.memory_space<vmem>>, vector<8x4xf32>
    tpu.vector_store %arg8[%c0_18, %c0_19], %24 {strides = array<i32>} : memref<8x4xf32, #tpu.memory_space<vmem>>, vector<8x4xf32>,
    return
  }
  func.func @transform_0(%arg0: i32) -> (i32, i32) {
    %c0_i32 = arith.constant 0 : i32
    %c0_i32_0 = arith.constant 0 : i32
    return %arg0, %c0_i32 : i32, i32
  }
  func.func @transform_1(%arg0: i32) -> (i32, i32) {
    %c0_i32 = arith.constant 0 : i32
    %c0_i32_0 = arith.constant 0 : i32
    %c0_i32_1 = arith.constant 0 : i32
    return %c0_i32, %c0_i32_0 : i32, i32
  }
  func.func @transform_2(%arg0: i32) -> (i32, i32) {
    %c0_i32 = arith.constant 0 : i32
    %c0_i32_0 = arith.constant 0 : i32
    %c0_i32_1 = arith.constant 0 : i32
    return %c0_i32, %c0_i32_0 : i32, i32
  }
  func.func @transform_3(%arg0: i32) -> (i32, i32) {
    %c0_i32 = arith.constant 0 : i32
    %c0_i32_0 = arith.constant 0 : i32
    %c0_i32_1 = arith.constant 0 : i32
    return %c0_i32, %c0_i32_0 : i32, i32
  }
  func.func @transform_4(%arg0: i32) -> (i32, i32) {
    %c0_i32 = arith.constant 0 : i32
    %c0_i32_0 = arith.constant 0 : i32
    %c0_i32_1 = arith.constant 0 : i32
    return %c0_i32, %c0_i32_0 : i32, i32
  }
  func.func @transform_5(%arg0: i32) -> (i32, i32) {
    %c0_i32 = arith.constant 0 : i32
    %c0_i32_0 = arith.constant 0 : i32
    %c0_i32_1 = arith.constant 0 : i32
    return %c0_i32, %c0_i32_0 : i32, i32
  }
  func.func @transform_6(%arg0: i32) -> (i32, i32) {
    %c0_i32 = arith.constant 0 : i32
    %c0_i32_0 = arith.constant 0 : i32
    %c0_i32_1 = arith.constant 0 : i32
    return %c0_i32, %c0_i32_0 : i32, i32
  }
  func.func @transform_7(%arg0: i32) -> (i32, i32) {
    %c0_i32 = arith.constant 0 : i32
    %c0_i32_0 = arith.constant 0 : i32
    return %arg0, %c0_i32 : i32, i32
  }
}

</mosaic_0001>

<bundles_post_ra>
// kernel: feedforward_nn.1
= control target key start
LH: loop header
LB: loop body
LE: loop exit
PB: predicated region body
PF: predicated region fallthrough
CT: control target
= control target key end

     0   :  { %12 = vsyncpa [#allocation3], 0  ;;  %s446_s0 = inlined_call_operand.vmem [shape: f32[8,16], index: 0, kind: input, shape index: {}]   ;;  %s447_s1 = inlined_call_operand.hbm [shape: f32[16,64], index: 1, kind: input, shape index: {}]   ;;  %s448_s2 = inlined_call_operand.hbm [shape: f32[1,64], index: 2, kind: input, shape index: {}]   ;;  %s449_s3 = inlined_call_operand.vmem [shape: f32[64,64], index: 3, kind: input, shape index: {}]   ;;  %s450_s4 = inlined_call_operand.hbm [shape: f32[1,64], index: 4, kind: input, shape index: {}]   ;;  %s451_s5 = inlined_call_operand.vmem [shape: f32[64,4], index: 5, kind: input, shape index: {}]   ;;  %s452_s6 = inlined_call_operand.hbm [shape: f32[1,4], index: 6, kind: input, shape index: {}]   ;;  %s453_s7 = inlined_call_operand.vmem [shape: f32[8,4], index: 7, kind: output, shape index: {}]  }
   0x1   :  { %13 = vsyncpa [#allocation5], 0  ;;  %s35_s26 = sshll.u32 %s448_s2, 4  ;;  %s36_s26 = int_to_ptr.hbm [resolvable:$true] %s35_s26 }
   0x2   :  { %14 = vsyncpa [#allocation8], 0  ;;  %s334_s27 = smov [#allocation4]   ;;  %s21_s8 = sshll.u32 %s447_s1, 4  ;;  %s22_s8 = int_to_ptr.hbm [resolvable:$true] %s21_s8 }
   0x3   :  { %s37_s28 = sshll.u32 %s334_s27, 4  ;;  %s335_s9 = smov [#allocation2]   ;;  %s38_s28 = int_to_ptr.vmem [resolvable:$true] %s37_s28 }
   0x4   :  { %40 = dma.hbm_to_vmem [thread:$0]  %s36_s26, 16, %s38_s28, [#allocation5]  }
   0x5   :  { %s23_s10 = sshll.u32 %s335_s9, 4  ;;  %s336_s11 = smov 128   ;;  %s24_s10 = int_to_ptr.vmem [resolvable:$true] %s23_s10 }
   0x6   :  { %s337_s12 = smov 8   ;;  %s48_s2 = sshll.u32 %s450_s4, 4  ;;  %s49_s2 = int_to_ptr.hbm [resolvable:$true] %s48_s2 }
   0x7   :  { %29 = dma.hbm_to_vmem [thread:$0]  %s22_s8, 256, %s24_s10, [#allocation3], %s336_s11, %s336_s11, %s337_s12  }
   0x8   :  { %s338_s15 = smov [#allocation6]   ;;  %s61_s1 = sshll.u32 %s452_s6, 4  ;;  %s62_s1 = int_to_ptr.hbm [resolvable:$true] %s61_s1 }
   0x9   :  { %s50_s16 = sshll.u32 %s338_s15, 4  ;;  %s339_s19 = smov [#allocation7]   ;;  %s51_s16 = int_to_ptr.vmem [resolvable:$true] %s50_s16 }
   0xa   :  { %53 = dma.hbm_to_vmem [thread:$0]  %s49_s2, 16, %s51_s16, [#allocation5]  }
   0xb   :  { %s63_s20 = sshll.u32 %s339_s19, 4  ;;  %s64_s20 = int_to_ptr.vmem [resolvable:$true] %s63_s20 }
   0xc   :  { %66 = dma.hbm_to_vmem [thread:$0]  %s62_s1, 16, %s64_s20, [#allocation8]  }
   0xd   :  { %328 = dma.done.wait [#allocation3], 256  }
   0xe   :  { %329 = vsyncadd [#allocation3], 4294967040 }
   0xf   :  { %330 = dma.done.wait [#allocation5], 32  }
  0x10   :  { %331 = vsyncadd [#allocation5], 4294967264 }
  0x11   :  { %332 = dma.done.wait [#allocation8], 16  }
  0x12   :  { %333 = vsyncadd [#allocation8], 4294967280  ;;  %v85_v0 = vld [vmem:[#allocation2 + $0x8] sm:$0xff]  ;;  %v84_v1 = vld [vmem:[#allocation2] sm:$0xff]  ;;  %vm90_vm0 = vcmask 130048   ;;  %vm127_vm1 = vcmask 523264  }
  0x13   :  { %108 = vmatpush.msra.mxu0 %v85_v0  ;;  %v83_v2 = vld [vmem:[%s446_s0] sm:$0xff]  ;;  %v122_v3 = vld [vmem:[%s449_s3 + $0x38] sm:$0xff]  ;;  %v121_v4 = vld [vmem:[%s449_s3 + $0x30] sm:$0xff]  ;;  %vm206_vm5 = vcmask 31744  }
  0x14   :  { %139 = vmatpush.msra.mxu1 %v122_v3  ;;  %v120_v5 = vld [vmem:[%s449_s3 + $0x28] sm:$0xff]  ;;  %v119_v6 = vld [vmem:[%s449_s3 + $0x20] sm:$0xff]  ;;  %v118_v7 = vld [vmem:[%s449_s3 + $0x18] sm:$0xff] }
  0x15   :  { %109 = vmatpush.msra.mxu0 %v84_v1  ;;  %v117_v8 = vld [vmem:[%s449_s3 + $0x10] sm:$0xff]  ;;  %v116_v9 = vld [vmem:[%s449_s3 + $0x8] sm:$0xff]  ;;  %v115_v10 = vld [vmem:[%s449_s3] sm:$0xff] }
  0x16   :  { %215 = vmatmul.msk.f32.vlgmr.msra.gmra.mxu0 %vm90_vm0, %v83_v2  ;;  %140 = vmatpush.msra.mxu1 %v121_v4  ;;  %v159_v11 = vld [vmem:[%s451_s5 + $0x38] sm:$0xff]  ;;  %v158_v12 = vld [vmem:[%s451_s5 + $0x30] sm:$0xff]  ;;  %v157_v13 = vld [vmem:[%s451_s5 + $0x28] sm:$0xff] }
  0x17   :  { %175 = vmatpush.msra.mxu2 %v159_v11  ;;  %v156_v14 = vld [vmem:[%s451_s5 + $0x20] sm:$0xff]  ;;  %v155_v15 = vld [vmem:[%s451_s5 + $0x18] sm:$0xff]  ;;  %v225_v16 = vld [vmem:[#allocation4] ss:$0 sm:$0xff] }
  0x18   :  { %141 = vmatpush.msra.mxu1 %v120_v5  ;;  %v154_v20 = vld [vmem:[%s451_s5 + $0x10] sm:$0xff]  ;;  %v153_v21 = vld [vmem:[%s451_s5 + $0x8] sm:$0xff]  ;;  %v152_v22 = vld [vmem:[%s451_s5] sm:$0xff] }
  0x19   :  { %176 = vmatpush.msra.mxu2 %v158_v12  ;;  %v226_v23 = vld [vmem:[#allocation6] ss:$0 sm:$0xff]  ;;  %v227_v27 = vld [vmem:[#allocation7] ss:$0 sm:$0xff] }
  0x1a   :  { %142 = vmatpush.msra.mxu1 %v119_v6 }
  0x1b   :  { %177 = vmatpush.msra.mxu2 %v157_v13 }
  0x1c   :  { %143 = vmatpush.msra.mxu1 %v118_v7 }
  0x1d   :  { %178 = vmatpush.msra.mxu2 %v156_v14 }
  0x1e   :  { %144 = vmatpush.msra.mxu1 %v117_v8 }
  0x1f   :  { %179 = vmatpush.msra.mxu2 %v155_v15 }
  0x20   :  { %145 = vmatpush.msra.mxu1 %v116_v9 }
  0x21   :  { %180 = vmatpush.msra.mxu2 %v154_v20 }
  0x22   :  { %146 = vmatpush.msra.mxu1 %v115_v10 }
  0x23   :  { %181 = vmatpush.msra.mxu2 %v153_v21 }
  0x25   :  { %182 = vmatpush.msra.mxu2 %v152_v22 }
  0x93   :  { %v111_v17 = vpop.f32.mrf.mxu0 }
  0x94   :  { %v112_v18 = vadd.f32 %v225_v16, %v111_v17 }
  0x96   :  { %v114_v19 = vmax.f32 %v112_v18, 0.0 }
  0x98   :  { %216 = vmatmul.msk.f32.vlgmr.msra.gmra.mxu1 %vm127_vm1, %v114_v19 }
 0x115   :  { %v148_v24 = vpop.f32.mrf.mxu1 }
 0x116   :  { %v149_v25 = vadd.f32 %v226_v23, %v148_v24 }
 0x118   :  { %v151_v26 = vmax.f32 %v149_v25, 0.0 }
 0x11a   :  { %217 = vmatmul.msk.f32.vlgmr.msra.gmra.mxu2 %vm127_vm1, %v151_v26 }
 0x19d   :  { %v184_v28 = vpop.f32.mrf.mxu2 }
 0x19e   :  { %v185_v29 = vadd.f32 %v227_v27, %v184_v28 }
 0x1a0   :  { %v218_v30 = vmul.f32 -1.442695, %v185_v29 }
 0x1a2   :  { %228 = vpow2.f32 %v218_v30 }
 0x1a8   :  { %v229_v31 = vpop.eup %228 }
 0x1a9   :  { %v190_v32 = vadd.f32 1.0, %v229_v31 }
 0x1ab   :  { %230 = vrcp.f32 %v190_v32  ;;  %v202_v36 = vand.u32 2147483648, %v190_v32  ;;  %v200_v38 = vand.u32 2147483647, %v190_v32  ;;  %vm196_vm3 = vweird.f32 %v190_v32 }
 0x1ad   :  { %v203_v40 = vor.u32 1.1754944e-38, %v202_v36  ;;  %vm201_vm6 = vcmp.eq.f32.partialorder %v200_v38, 8.507059e+37 }
 0x1b1   :  { %v231_v33 = vpop.eup %230 }
 0x1b2   :  { %v192_v34 = vmul.f32 %v231_v33, %v190_v32  ;;  %vm197_vm2 = vweird.f32 %v231_v33 }
 0x1b3   :  { %vm198_vm4 = vmor %vm196_vm3, %vm197_vm2 }
 0x1b4   :  { %v193_v35 = vsub.f32 1.0, %v192_v34 }
 0x1b6   :  { %v194_v37 = vmul.f32 %v231_v33, %v193_v35 }
 0x1b8   :  { %v195_v39 = vadd.f32 %v231_v33, %v194_v37 }
 0x1ba   :  { %v199_v41 = vsel %vm198_vm4, %v231_v33, %v195_v39 }
 0x1bb   :  { %v204_v42 = vsel %vm201_vm6, %v203_v40, %v199_v41 }
 0x1bc   :  { %207 = vst.msk [vmem:[%s453_s7] sm:$0xff] %vm206_vm5, %v204_v42 }
 0x1bd   :  { %212 = vsyncpa [#allocation3], 1 }
 0x1be   :  { %213 = vsyncpa [#allocation5], 1 }
 0x1bf   :  { %214 = vsyncpa [#allocation8], 1 }

</bundles_post_ra>
